<compile_context>
chip_gen: v6e
topology: v6e:2x2x1
jax: 0.10.0
libtpu: 0.0.40
codegen_flags: <defaults>
</compile_context>

<pallas_src>
import jax
import jax.numpy as jnp
from jax.experimental import pallas as pl
from jax.experimental.pallas import tpu as pltpu

BN_EPS = 1e-5
S_H1 = 256   # state_fc1 out
S_H2 = 128   # state_fc2 out
A_H  = 128   # action_fc1 out
C_IN = S_H2 + A_H   # 256
C_H1 = 256   # combined_fc1 out
C_H2 = 128   # combined_fc2 out


def _bn_prep(x):
    """Training-mode BatchNorm1d (gamma=1, beta=0, biased var) split for weight folding.

    Returns (relu(x - mu), inv_std). The positive per-feature inv_std commutes with relu and is
    applied to the next layer's weight rows instead of the (B, F) activation.
    """
    mu = jnp.mean(x, axis=0, keepdims=True)
    xc = x - mu
    var = jnp.mean(xc * xc, axis=0, keepdims=True)      # two-pass variance (no cancellation)
    return jnp.maximum(xc, 0.0), jax.lax.rsqrt(var + BN_EPS)


def critic_kernel(state_ref, action_ref,
                  w_s1_ref, w_s2t_ref,
                  w_a1_ref, b_a1_ref,
                  w_c1st_ref, w_c1at_ref, w_c2t_ref,
                  w_out_ref, b_out_ref,
                  q_ref):
    f32 = jnp.float32
    mm_dt = w_s2t_ref.dtype   # hidden-layer MXU operand dtype (bf16 fast path / f32 exact path)

    def dot_nt(x, w_t):
        # x: (B, K), w_t: (N, K) (PyTorch (out, in) layout) -> (B, N), f32 MXU accumulation.
        return jax.lax.dot_general(
            x.astype(mm_dt), w_t.astype(mm_dt),
            dimension_numbers=(((1,), (1,)), ((), ())),
            preferred_element_type=f32)

    # s = relu(bn1(state_fc1(state)))        [b_s1 dropped: exact no-op under training-mode BN]
    s = jnp.dot(state_ref[...], w_s1_ref[...], preferred_element_type=f32)   # f32 first layer
    r1, inv1 = _bn_prep(s)

    # s = relu(bn2(state_fc2(s)))            [bn1 inv_std folded into w_s2's K axis]
    s = dot_nt(r1, w_s2t_ref[...] * inv1)
    r2, inv2 = _bn_prep(s)

    # a = relu(action_fc1(action) + b_a1)    [bias kept: no BN follows]
    a = jnp.dot(action_ref[...], w_a1_ref[...], preferred_element_type=f32)  # f32 first layer
    a = jnp.maximum(a + b_a1_ref[...], 0.0)

    # x = combined_fc1(cat([s, a], 1)): two accumulating K=128 dots, no VMEM concat buffer.
    # bn2's inv_std folds into the state half of combined_fc1 only.
    x = dot_nt(r2, w_c1st_ref[...] * inv2) + dot_nt(a, w_c1at_ref[...])
    r3, inv3 = _bn_prep(x)

    # x = relu(bn4(combined_fc2(x)))         [bn3 inv_std folded into w_c2]
    x = dot_nt(r3, w_c2t_ref[...] * inv3)
    r4, inv4 = _bn_prep(x)

    # q = output(x): 128 -> 1 as a VPU multiply + lane (XLU) reduction; bn4 inv_std folded into
    # the (1, 128) output row; output bias read as an SMEM scalar.
    q_ref[...] = (jnp.sum(r4 * (w_out_ref[...] * inv4), axis=-1, keepdims=True)
                  + b_out_ref[0, 0])


def xavier_uniform(key, fan_in, fan_out):
    bound = (6.0 / (fan_in + fan_out)) ** 0.5
    return jax.random.uniform(key, (fan_in, fan_out), jnp.float32, -bound, bound)


def init_params(key, state_dim, action_dim):
    ks = jax.random.split(key, 6)
    return {
        "w_s1": xavier_uniform(ks[0], state_dim, S_H1),  "b_s1": jnp.zeros((1, S_H1), jnp.float32),
        "w_s2": xavier_uniform(ks[1], S_H1, S_H2),       "b_s2": jnp.zeros((1, S_H2), jnp.float32),
        "w_a1": xavier_uniform(ks[2], action_dim, A_H),  "b_a1": jnp.zeros((1, A_H), jnp.float32),
        "w_c1": xavier_uniform(ks[3], C_IN, C_H1),       "b_c1": jnp.zeros((1, C_H1), jnp.float32),
        "w_c2": xavier_uniform(ks[4], C_H1, C_H2),       "b_c2": jnp.zeros((1, C_H2), jnp.float32),
        "w_out": xavier_uniform(ks[5], C_H2, 1),         "b_out": jnp.zeros((1, 1), jnp.float32),
    }


def _vmem_limit_bytes(batch, state_dim, action_dim, mm_bytes):
    weight_bytes = (state_dim * S_H1 + action_dim * A_H) * 4 \
                 + (S_H1 * S_H2 + C_IN * C_H1 + C_H1 * C_H2 + C_H2) * mm_bytes
    act_bytes = batch * (state_dim + action_dim + S_H1 + S_H2 + A_H
                         + C_H1 + C_H2 + 1) * 4
    est = weight_bytes + act_bytes + (4 << 20)   # headroom for compiler scratch / spills
    try:
        cap = pltpu.get_tpu_info().vmem_capacity_bytes   # 128 MiB v5e/v6e, 64 MiB v7x
    except Exception:
        cap = 64 << 20                                   # conservative fallback (v7x)
    return int(min(max(est, 16 << 20), (cap * 3) // 4))


def critic_forward(state, action, params, matmul_dtype=jnp.bfloat16):
    """Pallas forward pass. matmul_dtype controls the hidden-layer MXU operand precision."""
    B, state_dim = state.shape
    action_dim = action.shape[1]
    mm_dt = jnp.dtype(matmul_dtype)

    # Hidden-layer weights go in PyTorch's (out, in) layout so the (1, K) BN inv_std row
    # broadcasts over their K axis in-kernel with no relayout; combined_fc1 is pre-split into
    # its state half (input rows :128) and action half (rows 128:).  First-layer weights stay
    # f32.  Pre-BN biases b_s1/b_s2/b_c1/b_c2 are NOT passed: each is immediately followed by
    # training-mode BatchNorm (mean subtraction, gamma=1, beta=0), so the add is a no-op.
    w_s2t  = params["w_s2"].T.astype(mm_dt)          # (128, 256)
    w_c1st = params["w_c1"][:S_H2].T.astype(mm_dt)   # (256, 128)
    w_c1at = params["w_c1"][S_H2:].T.astype(mm_dt)   # (256, 128)
    w_c2t  = params["w_c2"].T.astype(mm_dt)          # (128, 256)

    args = (state, action,
            params["w_s1"], w_s2t,
            params["w_a1"], params["b_a1"],
            w_c1st, w_c1at, w_c2t,
            params["w_out"].reshape(1, C_H2),        # (1, 128) f32 row for VPU+reduce output
            params["b_out"])                         # (1, 1) -> SMEM scalar

    vmem = pl.BlockSpec(memory_space=pltpu.MemorySpace.VMEM)
    smem = pl.BlockSpec(memory_space=pltpu.MemorySpace.SMEM)
    return pl.pallas_call(
        critic_kernel,
        out_shape=jax.ShapeDtypeStruct((B, 1), jnp.float32),
        in_specs=[vmem] * 10 + [smem],
        out_specs=vmem,
        compiler_params=pltpu.CompilerParams(
            vmem_limit_bytes=_vmem_limit_bytes(B, state_dim, action_dim, mm_dt.itemsize)),
    )(*args)


def critic_reference(state, action, params):
    """Pure-JAX reference with PyTorch-module semantics (training-mode BN, full-f32 matmuls)."""
    hi = jax.lax.Precision.HIGHEST

    def bn_relu(x):
        mu = jnp.mean(x, axis=0, keepdims=True)
        var = jnp.mean((x - mu) ** 2, axis=0, keepdims=True)
        return jnp.maximum((x - mu) / jnp.sqrt(var + BN_EPS), 0.0)

    s = bn_relu(jnp.dot(state, params["w_s1"], precision=hi) + params["b_s1"])
    s = bn_relu(jnp.dot(s, params["w_s2"], precision=hi) + params["b_s2"])
    a = jnp.maximum(jnp.dot(action, params["w_a1"], precision=hi) + params["b_a1"], 0.0)
    x = jnp.concatenate([s, a], axis=1)
    x = bn_relu(jnp.dot(x, params["w_c1"], precision=hi) + params["b_c1"])
    x = bn_relu(jnp.dot(x, params["w_c2"], precision=hi) + params["b_c2"])
    return jnp.dot(x, params["w_out"], precision=hi) + params["b_out"]


if __name__ == "__main__":
    STATE_DIM, ACTION_DIM, BATCH = 16, 8, 8

    key = jax.random.PRNGKey(0)
    k_state, k_action, k_params = jax.random.split(key, 3)

    state = jax.random.normal(k_state, (BATCH, STATE_DIM), jnp.float32)
    action = jax.random.normal(k_action, (BATCH, ACTION_DIM), jnp.float32)
    params = init_params(k_params, STATE_DIM, ACTION_DIM)

    q_ref = critic_reference(state, action, params)

    # 1) Exact-precision path: f32 MXU operands everywhere.  Tolerance covers the in-kernel
    #    BN-scale fold reassociation and MXU f32 pass decomposition.
    q_f32 = jax.block_until_ready(critic_forward(state, action, params, matmul_dtype=jnp.float32))
    assert q_f32.shape == (BATCH, 1)
    assert jnp.allclose(q_f32, q_ref, atol=5e-3, rtol=5e-3), (q_f32, q_ref)

    # 2) Fast path: bf16 hidden-layer MXU operands, f32 accumulation, f32 first layers.
    q_bf16 = jax.block_until_ready(critic_forward(state, action, params, matmul_dtype=jnp.bfloat16))
    assert q_bf16.shape == (BATCH, 1)
    assert jnp.allclose(q_bf16, q_ref, atol=5e-2, rtol=5e-2), (q_bf16, q_ref)

    print("KERNEL_OK")
</pallas_src>

<mosaic_0001>
module attributes {stable_mosaic.version = 11 : i64} {
  func.func @critic_kernel(%arg0: memref<8x16xf32, #tpu.memory_space<vmem>>, %arg1: memref<8x8xf32, #tpu.memory_space<vmem>>, %arg2: memref<16x256xf32, #tpu.memory_space<vmem>>, %arg3: memref<128x256xf32, #tpu.memory_space<vmem>>, %arg4: memref<8x128xf32, #tpu.memory_space<vmem>>, %arg5: memref<1x128xf32, #tpu.memory_space<vmem>>, %arg6: memref<256x128xf32, #tpu.memory_space<vmem>>, %arg7: memref<256x128xf32, #tpu.memory_space<vmem>>, %arg8: memref<128x256xf32, #tpu.memory_space<vmem>>, %arg9: memref<1x128xf32, #tpu.memory_space<vmem>>, %arg10: memref<1x1xf32, #tpu.memory_space<smem>>, %arg11: memref<8x1xf32, #tpu.memory_space<vmem>>) attributes {dimension_semantics = [], scalar_prefetch = 0 : i64, scratch_operands = 0 : i64, tpu.core_type = #tpu.core_type<tc>} {
    %c0 = arith.constant 0 : index
    %c0_0 = arith.constant 0 : index
    %0 = vector.load %arg0[%c0, %c0_0] : memref<8x16xf32, #tpu.memory_space<vmem>>, vector<8x16xf32>
    %c0_1 = arith.constant 0 : index
    %c0_2 = arith.constant 0 : index
    %1 = vector.load %arg2[%c0_1, %c0_2] : memref<16x256xf32, #tpu.memory_space<vmem>>, vector<16x256xf32>
    %cst = arith.constant dense<0.000000e+00> : vector<8x256xf32>
    %2 = tpu.matmul %0, %1, %cst {dimension_numbers = #tpu.dot_dimension_numbers<[1], [0], [0], [1], [0, 0, 1, 1], [], []>} : vector<8x16xf32>, vector<16x256xf32>, vector<8x256xf32> -> vector<8x256xf32>
    %cst_3 = arith.constant dense<0.000000e+00> : vector<256xf32>
    %3 = vector.multi_reduction <add>, %2, %cst_3 [0] : vector<8x256xf32> to vector<256xf32>
    %4 = vector.shape_cast %3 : vector<256xf32> to vector<1x256xf32>
    %cst_4 = arith.constant 8.000000e+00 : f32
    %5 = vector.broadcast %cst_4 : f32 to vector<1x256xf32>
    %6 = arith.divf %4, %5 : vector<1x256xf32>
    %7 = vector.broadcast %6 : vector<1x256xf32> to vector<8x256xf32>
    %8 = arith.subf %2, %7 : vector<8x256xf32>
    %9 = arith.mulf %8, %8 : vector<8x256xf32>
    %cst_5 = arith.constant dense<0.000000e+00> : vector<256xf32>
    %10 = vector.multi_reduction <add>, %9, %cst_5 [0] : vector<8x256xf32> to vector<256xf32>
    %11 = vector.shape_cast %10 : vector<256xf32> to vector<1x256xf32>
    %cst_6 = arith.constant 8.000000e+00 : f32
    %12 = vector.broadcast %cst_6 : f32 to vector<1x256xf32>
    %13 = arith.divf %11, %12 : vector<1x256xf32>
    %cst_7 = arith.constant 0.000000e+00 : f32
    %14 = vector.broadcast %cst_7 : f32 to vector<8x256xf32>
    %15 = arith.maximumf %8, %14 : vector<8x256xf32>
    %cst_8 = arith.constant 9.99999974E-6 : f32
    %16 = vector.broadcast %cst_8 : f32 to vector<1x256xf32>
    %17 = arith.addf %13, %16 : vector<1x256xf32>
    %18 = math.rsqrt %17 : vector<1x256xf32>
    %c0_9 = arith.constant 0 : index
    %c0_10 = arith.constant 0 : index
    %19 = vector.load %arg3[%c0_9, %c0_10] : memref<128x256xf32, #tpu.memory_space<vmem>>, vector<128x256xf32>
    %20 = vector.broadcast %18 : vector<1x256xf32> to vector<128x256xf32>
    %21 = arith.mulf %19, %20 : vector<128x256xf32>
    %cst_11 = arith.constant dense<0.000000e+00> : vector<8x128xf32>
    %22 = tpu.matmul %15, %21, %cst_11 {dimension_numbers = #tpu.dot_dimension_numbers<[1], [1], [0], [0], [0, 0, 1, 0], [], []>} : vector<8x256xf32>, vector<128x256xf32>, vector<8x128xf32> -> vector<8x128xf32>
    %cst_12 = arith.constant dense<0.000000e+00> : vector<128xf32>
    %23 = vector.multi_reduction <add>, %22, %cst_12 [0] : vector<8x128xf32> to vector<128xf32>
    %24 = vector.shape_cast %23 : vector<128xf32> to vector<1x128xf32>
    %cst_13 = arith.constant 8.000000e+00 : f32
    %25 = vector.broadcast %cst_13 : f32 to vector<1x128xf32>
    %26 = arith.divf %24, %25 : vector<1x128xf32>
    %27 = vector.broadcast %26 : vector<1x128xf32> to vector<8x128xf32>
    %28 = arith.subf %22, %27 : vector<8x128xf32>
    %29 = arith.mulf %28, %28 : vector<8x128xf32>
    %cst_14 = arith.constant dense<0.000000e+00> : vector<128xf32>
    %30 = vector.multi_reduction <add>, %29, %cst_14 [0] : vector<8x128xf32> to vector<128xf32>
    %31 = vector.shape_cast %30 : vector<128xf32> to vector<1x128xf32>
    %cst_15 = arith.constant 8.000000e+00 : f32
    %32 = vector.broadcast %cst_15 : f32 to vector<1x128xf32>
    %33 = arith.divf %31, %32 : vector<1x128xf32>
    %cst_16 = arith.constant 0.000000e+00 : f32
    %34 = vector.broadcast %cst_16 : f32 to vector<8x128xf32>
    %35 = arith.maximumf %28, %34 : vector<8x128xf32>
    %cst_17 = arith.constant 9.99999974E-6 : f32
    %36 = vector.broadcast %cst_17 : f32 to vector<1x128xf32>
    %37 = arith.addf %33, %36 : vector<1x128xf32>
    %38 = math.rsqrt %37 : vector<1x128xf32>
    %c0_18 = arith.constant 0 : index
    %c0_19 = arith.constant 0 : index
    %39 = vector.load %arg1[%c0_18, %c0_19] : memref<8x8xf32, #tpu.memory_space<vmem>>, vector<8x8xf32>
    %c0_20 = arith.constant 0 : index
    %c0_21 = arith.constant 0 : index
    %40 = vector.load %arg4[%c0_20, %c0_21] : memref<8x128xf32, #tpu.memory_space<vmem>>, vector<8x128xf32>
    %cst_22 = arith.constant dense<0.000000e+00> : vector<8x128xf32>
    %41 = tpu.matmul %39, %40, %cst_22 {dimension_numbers = #tpu.dot_dimension_numbers<[1], [0], [0], [1], [0, 0, 1, 1], [], []>} : vector<8x8xf32>, vector<8x128xf32>, vector<8x128xf32> -> vector<8x128xf32>
    %c0_23 = arith.constant 0 : index
    %c0_24 = arith.constant 0 : index
    %42 = vector.load %arg5[%c0_23, %c0_24] : memref<1x128xf32, #tpu.memory_space<vmem>>, vector<1x128xf32>
    %43 = vector.broadcast %42 : vector<1x128xf32> to vector<8x128xf32>
    %44 = arith.addf %41, %43 : vector<8x128xf32>
    %cst_25 = arith.constant 0.000000e+00 : f32
    %45 = vector.broadcast %cst_25 : f32 to vector<8x128xf32>
    %46 = arith.maximumf %44, %45 : vector<8x128xf32>
    %c0_26 = arith.constant 0 : index
    %c0_27 = arith.constant 0 : index
    %47 = vector.load %arg6[%c0_26, %c0_27] : memref<256x128xf32, #tpu.memory_space<vmem>>, vector<256x128xf32>
    %48 = vector.broadcast %38 : vector<1x128xf32> to vector<256x128xf32>
    %49 = arith.mulf %47, %48 : vector<256x128xf32>
    %cst_28 = arith.constant dense<0.000000e+00> : vector<8x256xf32>
    %50 = tpu.matmul %35, %49, %cst_28 {dimension_numbers = #tpu.dot_dimension_numbers<[1], [1], [0], [0], [0, 0, 1, 0], [], []>} : vector<8x128xf32>, vector<256x128xf32>, vector<8x256xf32> -> vector<8x256xf32>
    %c0_29 = arith.constant 0 : index
    %c0_30 = arith.constant 0 : index
    %51 = vector.load %arg7[%c0_29, %c0_30] : memref<256x128xf32, #tpu.memory_space<vmem>>, vector<256x128xf32>
    %cst_31 = arith.constant dense<0.000000e+00> : vector<8x256xf32>
    %52 = tpu.matmul %46, %51, %cst_31 {dimension_numbers = #tpu.dot_dimension_numbers<[1], [1], [0], [0], [0, 0, 1, 0], [], []>} : vector<8x128xf32>, vector<256x128xf32>, vector<8x256xf32> -> vector<8x256xf32>
    %53 = arith.addf %50, %52 : vector<8x256xf32>
    %cst_32 = arith.constant dense<0.000000e+00> : vector<256xf32>
    %54 = vector.multi_reduction <add>, %53, %cst_32 [0] : vector<8x256xf32> to vector<256xf32>
    %55 = vector.shape_cast %54 : vector<256xf32> to vector<1x256xf32>
    %cst_33 = arith.constant 8.000000e+00 : f32
    %56 = vector.broadcast %cst_33 : f32 to vector<1x256xf32>
    %57 = arith.divf %55, %56 : vector<1x256xf32>
    %58 = vector.broadcast %57 : vector<1x256xf32> to vector<8x256xf32>
    %59 = arith.subf %53, %58 : vector<8x256xf32>
    %60 = arith.mulf %59, %59 : vector<8x256xf32>
    %cst_34 = arith.constant dense<0.000000e+00> : vector<256xf32>
    %61 = vector.multi_reduction <add>, %60, %cst_34 [0] : vector<8x256xf32> to vector<256xf32>
    %62 = vector.shape_cast %61 : vector<256xf32> to vector<1x256xf32>
    %cst_35 = arith.constant 8.000000e+00 : f32
    %63 = vector.broadcast %cst_35 : f32 to vector<1x256xf32>
    %64 = arith.divf %62, %63 : vector<1x256xf32>
    %cst_36 = arith.constant 0.000000e+00 : f32
    %65 = vector.broadcast %cst_36 : f32 to vector<8x256xf32>
    %66 = arith.maximumf %59, %65 : vector<8x256xf32>
    %cst_37 = arith.constant 9.99999974E-6 : f32
    %67 = vector.broadcast %cst_37 : f32 to vector<1x256xf32>
    %68 = arith.addf %64, %67 : vector<1x256xf32>
    %69 = math.rsqrt %68 : vector<1x256xf32>
    %c0_38 = arith.constant 0 : index
    %c0_39 = arith.constant 0 : index
    %70 = vector.load %arg8[%c0_38, %c0_39] : memref<128x256xf32, #tpu.memory_space<vmem>>, vector<128x256xf32>
    %71 = vector.broadcast %69 : vector<1x256xf32> to vector<128x256xf32>
    %72 = arith.mulf %70, %71 : vector<128x256xf32>
    %cst_40 = arith.constant dense<0.000000e+00> : vector<8x128xf32>
    %73 = tpu.matmul %66, %72, %cst_40 {dimension_numbers = #tpu.dot_dimension_numbers<[1], [1], [0], [0], [0, 0, 1, 0], [], []>} : vector<8x256xf32>, vector<128x256xf32>, vector<8x128xf32> -> vector<8x128xf32>
    %cst_41 = arith.constant dense<0.000000e+00> : vector<128xf32>
    %74 = vector.multi_reduction <add>, %73, %cst_41 [0] : vector<8x128xf32> to vector<128xf32>
    %75 = vector.shape_cast %74 : vector<128xf32> to vector<1x128xf32>
    %cst_42 = arith.constant 8.000000e+00 : f32
    %76 = vector.broadcast %cst_42 : f32 to vector<1x128xf32>
    %77 = arith.divf %75, %76 : vector<1x128xf32>
    %78 = vector.broadcast %77 : vector<1x128xf32> to vector<8x128xf32>
    %79 = arith.subf %73, %78 : vector<8x128xf32>
    %80 = arith.mulf %79, %79 : vector<8x128xf32>
    %cst_43 = arith.constant dense<0.000000e+00> : vector<128xf32>
    %81 = vector.multi_reduction <add>, %80, %cst_43 [0] : vector<8x128xf32> to vector<128xf32>
    %82 = vector.shape_cast %81 : vector<128xf32> to vector<1x128xf32>
    %cst_44 = arith.constant 8.000000e+00 : f32
    %83 = vector.broadcast %cst_44 : f32 to vector<1x128xf32>
    %84 = arith.divf %82, %83 : vector<1x128xf32>
    %cst_45 = arith.constant 0.000000e+00 : f32
    %85 = vector.broadcast %cst_45 : f32 to vector<8x128xf32>
    %86 = arith.maximumf %79, %85 : vector<8x128xf32>
    %cst_46 = arith.constant 9.99999974E-6 : f32
    %87 = vector.broadcast %cst_46 : f32 to vector<1x128xf32>
    %88 = arith.addf %84, %87 : vector<1x128xf32>
    %89 = math.rsqrt %88 : vector<1x128xf32>
    %c0_47 = arith.constant 0 : index
    %c0_48 = arith.constant 0 : index
    %90 = vector.load %arg9[%c0_47, %c0_48] : memref<1x128xf32, #tpu.memory_space<vmem>>, vector<1x128xf32>
    %91 = arith.mulf %90, %89 : vector<1x128xf32>
    %92 = vector.broadcast %91 : vector<1x128xf32> to vector<8x128xf32>
    %93 = arith.mulf %86, %92 : vector<8x128xf32>
    %cst_49 = arith.constant dense<0.000000e+00> : vector<8xf32>
    %94 = vector.multi_reduction <add>, %93, %cst_49 [1] : vector<8x128xf32> to vector<8xf32>
    %95 = vector.shape_cast %94 : vector<8xf32> to vector<8x1xf32>
    %c0_50 = arith.constant 0 : index
    %c0_51 = arith.constant 0 : index
    %96 = memref.load %arg10[%c0_50, %c0_51] : memref<1x1xf32, #tpu.memory_space<smem>>
    %97 = vector.broadcast %96 : f32 to vector<8x1xf32>
    %98 = arith.addf %95, %97 : vector<8x1xf32>
    %c0_52 = arith.constant 0 : index
    %c0_53 = arith.constant 0 : index
    %99 = vector.load %arg11[%c0_52, %c0_53] : memref<8x1xf32, #tpu.memory_space<vmem>>, vector<8x1xf32>
    tpu.vector_store %arg11[%c0_52, %c0_53], %98 {strides = array<i32>} : memref<8x1xf32, #tpu.memory_space<vmem>>, vector<8x1xf32>,
    return
  }
}

</mosaic_0001>

<bundles_post_ra>
// kernel: tpu_custom_call.1
= control target key start
LH: loop header
LB: loop body
LE: loop exit
PB: predicated region body
PF: predicated region fallthrough
CT: control target
= control target key end

     0   :  { %17 = vsyncpa [#allocation4], 0  ;;  %s1439_s0 = inlined_call_operand.hbm [shape: f32[8,16], index: 0, kind: input, shape index: {}]   ;;  %s1440_s1 = inlined_call_operand.hbm [shape: f32[8,8], index: 1, kind: input, shape index: {}]   ;;  %s1441_s2 = inlined_call_operand.hbm [shape: f32[16,256], index: 2, kind: input, shape index: {}]   ;;  %s1442_s3 = inlined_call_operand.hbm [shape: f32[128,256], index: 3, kind: input, shape index: {}]   ;;  %s1443_s4 = inlined_call_operand.vmem [shape: f32[8,128], index: 4, kind: input, shape index: {}]   ;;  %s1444_s5 = inlined_call_operand.vmem [shape: f32[1,128], index: 5, kind: input, shape index: {}]   ;;  %s1445_s6 = inlined_call_operand.hbm [shape: f32[256,128], index: 6, kind: input, shape index: {}]   ;;  %s1446_s7 = inlined_call_operand.hbm [shape: f32[256,128], index: 7, kind: input, shape index: {}]   ;;  %s1447_s8 = inlined_call_operand.hbm [shape: f32[128,256], index: 8, kind: input, shape index: {}]   ;;  %s1448_s9 = inlined_call_operand.vmem [shape: f32[1,128], index: 9, kind: input, shape index: {}]   ;;  %s1449_s10 = inlined_call_operand.<no memory space> [shape: f32[1,1], index: 10, kind: input, shape index: {}]   ;;  %s1450_s11 = inlined_call_operand.vmem [shape: f32[8,1], index: 11, kind: output, shape index: {}]  }
   0x1   :  { %18 = vsyncpa [#allocation6], 0 }
   0x2   :  { %19 = vsyncpa [#allocation9], 0 }
   0x3   :  { %20 = vsyncpa [#allocation12], 0  ;;  %s1190_s17 = smov [#allocation5]  }
   0x4   :  { %s37_s18 = sshll.u32 %s1190_s17, 4  ;;  %s38_s18 = int_to_ptr.vmem [resolvable:$true] %s37_s18 }
   0x5   :  { %s1050_s19 = scalar_lea.vmem %s38_s18, 128  ;;  %p1055_p1 = scmp.lt.s32.totalorder %s38_s18, %s38_s18 }
   0x6   :  { %p1051_p0 = scmp.ne.s32.totalorder %s38_s18, %s1050_s19  ;;  %p1056_p2 = scmp.lt.s32.totalorder %s1050_s19, %s1050_s19 }
   0x8   :  { %p1057_p3 = por %p1056_p2, %p1055_p1 }
   0xa   :  { %p1058_p4 = pnand %p1057_p3, %p1051_p0 }
   0xc   :  { %1061 = shalt.err (!%p1058_p4)
}
   0xd   :  { %40 = dma.hbm_to_vmem [thread:$0]  %s1440_s1, 128, %s38_s18, [#allocation6]  }
   0xe   :  { %s1191_s22 = smov [#allocation8]  }
   0xf   :  { %s58_s23 = sshll.u32 %s1191_s22, 4  ;;  %s59_s23 = int_to_ptr.vmem [resolvable:$true] %s58_s23 }
  0x10   :  { %s1070_s24 = scalar_lea.vmem %s59_s23, 4096  ;;  %p1075_p6 = scmp.lt.s32.totalorder %s59_s23, %s59_s23 }
  0x11   :  { %p1071_p5 = scmp.ne.s32.totalorder %s59_s23, %s1070_s24  ;;  %p1076_p7 = scmp.lt.s32.totalorder %s1070_s24, %s1070_s24 }
  0x13   :  { %p1077_p8 = por %p1076_p7, %p1075_p6 }
  0x15   :  { %p1078_p9 = pnand %p1077_p8, %p1071_p5 }
  0x17   :  { %1081 = shalt.err (!%p1078_p9)
}
  0x18   :  { %s1192_s25 = smov 256   ;;  %s1193_s26 = smov 16  }
  0x19   :  { %64 = dma.hbm_to_vmem [thread:$0]  %s1442_s3, 4096, %s59_s23, [#allocation9], %s1192_s25, %s1192_s25, %s1193_s26  }
  0x1a   :  { %s1194_s1 = smov [#allocation11]   ;;  %s1195_s30 = smov [#allocation3]  }
  0x1b   :  { %s86_s29 = sshll.u32 %s1194_s1, 4  ;;  %s27_s12 = sshll.u32 %s1195_s30, 4  ;;  %s87_s29 = int_to_ptr.vmem [resolvable:$true] %s86_s29  ;;  %s28_s12 = int_to_ptr.vmem [resolvable:$true] %s27_s12 }
  0x1c   :  { %s1090_s13 = scalar_lea.vmem %s87_s29, 4096  ;;  %p1095_p11 = scmp.lt.s32.totalorder %s87_s29, %s87_s29 }
  0x1d   :  { %p1091_p10 = scmp.ne.s32.totalorder %s87_s29, %s1090_s13  ;;  %p1096_p12 = scmp.lt.s32.totalorder %s1090_s13, %s1090_s13 }
  0x1f   :  { %p1097_p13 = por %p1096_p12, %p1095_p11 }
  0x21   :  { %p1098_p0 = pnand %p1097_p13, %p1091_p10 }
  0x23   :  { %1101 = shalt.err (!%p1098_p0)
}
  0x24   :  { %s1196_s14 = smov 128   ;;  %s1197_s15 = smov 8  }
  0x25   :  { %92 = dma.hbm_to_vmem [thread:$0]  %s1446_s7, 4096, %s87_s29, [#allocation12], %s1196_s14, %s1196_s14, %s1197_s15  }
  0x26   :  { %s1110_s17 = scalar_lea.vmem %s28_s12, 128  ;;  %p1115_p2 = scmp.lt.s32.totalorder %s28_s12, %s28_s12 }
  0x27   :  { %p1111_p1 = scmp.ne.s32.totalorder %s28_s12, %s1110_s17  ;;  %p1116_p3 = scmp.lt.s32.totalorder %s1110_s17, %s1110_s17 }
  0x29   :  { %p1117_p4 = por %p1116_p3, %p1115_p2 }
  0x2b   :  { %p1118_p5 = pnand %p1117_p4, %p1111_p1 }
  0x2d   :  { %1121 = shalt.err (!%p1118_p5)
}
  0x2e   :  { %30 = dma.hbm_to_vmem [thread:$0]  %s1439_s0, 128, %s28_s12, [#allocation4]  }
  0x2f   :  { %s1198_s20 = smov [#allocation7]   ;;  %s1199_s22 = smov [#allocation10]  }
  0x30   :  { %s46_s21 = sshll.u32 %s1198_s20, 4  ;;  %s74_s23 = sshll.u32 %s1199_s22, 4  ;;  %s47_s21 = int_to_ptr.vmem [resolvable:$true] %s46_s21  ;;  %s75_s23 = int_to_ptr.vmem [resolvable:$true] %s74_s23 }
  0x31   :  { %s1130_s24 = scalar_lea.vmem %s47_s21, 512  ;;  %p1135_p7 = scmp.lt.s32.totalorder %s47_s21, %s47_s21 }
  0x32   :  { %p1131_p6 = scmp.ne.s32.totalorder %s47_s21, %s1130_s24  ;;  %p1136_p8 = scmp.lt.s32.totalorder %s1130_s24, %s1130_s24 }
  0x34   :  { %p1137_p9 = por %p1136_p8, %p1135_p7 }
  0x36   :  { %p1138_p10 = pnand %p1137_p9, %p1131_p6 }
  0x38   :  { %1141 = shalt.err (!%p1138_p10)
}
  0x39   :  { %52 = dma.hbm_to_vmem [thread:$0]  %s1441_s2, 512, %s47_s21, [#allocation6], %s1192_s25, %s1192_s25, %s1193_s26  }
  0x3a   :  { %s1150_s0 = scalar_lea.vmem %s75_s23, 4096  ;;  %p1155_p12 = scmp.lt.s32.totalorder %s75_s23, %s75_s23 }
  0x3b   :  { %p1151_p11 = scmp.ne.s32.totalorder %s75_s23, %s1150_s0  ;;  %p1156_p13 = scmp.lt.s32.totalorder %s1150_s0, %s1150_s0 }
  0x3d   :  { %p1157_p0 = por %p1156_p13, %p1155_p12 }
  0x3f   :  { %p1158_p1 = pnand %p1157_p0, %p1151_p11 }
  0x41   :  { %1161 = shalt.err (!%p1158_p1)
}
  0x42   :  { %80 = dma.hbm_to_vmem [thread:$0]  %s1445_s6, 4096, %s75_s23, [#allocation9], %s1196_s14, %s1196_s14, %s1197_s15  }
  0x43   :  { %s1200_s29 = smov [#allocation13]  }
  0x44   :  { %s98_s30 = sshll.u32 %s1200_s29, 4  ;;  %s99_s30 = int_to_ptr.vmem [resolvable:$true] %s98_s30 }
  0x45   :  { %s1170_s12 = scalar_lea.vmem %s99_s30, 4096  ;;  %p1175_p3 = scmp.lt.s32.totalorder %s99_s30, %s99_s30 }
  0x46   :  { %p1171_p2 = scmp.ne.s32.totalorder %s99_s30, %s1170_s12  ;;  %p1176_p4 = scmp.lt.s32.totalorder %s1170_s12, %s1170_s12 }
  0x48   :  { %p1177_p5 = por %p1176_p4, %p1175_p3 }
  0x4a   :  { %p1178_p6 = pnand %p1177_p5, %p1171_p2 }
  0x4c   :  { %1181 = shalt.err (!%p1178_p6)
}
  0x4d   :  { %104 = dma.hbm_to_vmem [thread:$0]  %s1447_s8, 4096, %s99_s30, [#allocation12], %s1192_s25, %s1192_s25, %s1193_s26  }
  0x4e   :  { %1182 = dma.done.wait [#allocation4], 128  }
  0x4f   :  { %1183 = vsyncadd [#allocation4], 4294967168 }
  0x50   :  { %1184 = dma.done.wait [#allocation6], 640  }
  0x51   :  { %1185 = vsyncadd [#allocation6], 4294966656 }
  0x52   :  { %1186 = dma.done.wait [#allocation9], 8192  }
  0x53   :  { %1187 = vsyncadd [#allocation9], 4294959104 }
  0x54   :  { %1188 = dma.done.wait [#allocation12], 8192  }
  0x55   :  { %1189 = vsyncadd [#allocation12], 4294959104  ;;  %v1201_v0 = vmov 0.0   ;;  %v134_v1 = vld [vmem:[#allocation7 + $0x18] sm:$0xff]  ;;  %v133_v2 = vld [vmem:[#allocation7 + $0x10] sm:$0xff]  ;;  %vm135_vm0 = vcmask 130048  }
  0x56   :  { %203 = vmatprep.mubr.f32.mxu1 %v1201_v0  ;;  %1012 = vmatprep.subr.mxu0 %v1201_v0  ;;  %v132_v3 = vld [vmem:[#allocation7 + $0x8] sm:$0xff]  ;;  %v131_v4 = vld [vmem:[#allocation7] sm:$0xff]  ;;  %v130_v5 = vld [vmem:[#allocation3] sm:$0xff]  ;;  %vm411_vm1 = vcmask 64512   ;;  %vm1202_vm2 = vmmov 0   ;;  %vm929_vm3 = vcmask 7168  }
  0x57   :  { %167 = vmatprep.subr.mxu1 %v134_v1  ;;  %v403_v6 = vld [vmem:[%s1443_s4] sm:$0xff]  ;;  %v402_v7 = vld [vmem:[#allocation5] sm:$0xff]  ;;  %1014 = vmatprep.mubr.msk.f32.mxu0 %vm1202_vm2, %v1201_v0  ;;  %v278_v49 = vld [vmem:[#allocation8 + $0xe8] sm:$0xff] }
  0x58   :  { %168 = vmatpush1.msra.mxu1 %v133_v2  ;;  %1013 = vmatpush3.msra.mxu0 %v403_v6  ;;  %v280_v45 = vld [vmem:[#allocation8 + $0xf8] sm:$0xff]  ;;  %v279_v47 = vld [vmem:[#allocation8 + $0xf0] sm:$0xff]  ;;  %v277_v53 = vld [vmem:[#allocation8 + $0xe0] sm:$0xff] }
  0x59   :  { %169 = vmatprep.subr.mxu1 %v132_v3  ;;  %1015 = vmatmul.mubr.msk.f32.vlgmr.msra.gmra.mxu0 %vm411_vm1, %v402_v7  ;;  %v276_v54 = vld [vmem:[#allocation8 + $0xd8] sm:$0xff]  ;;  %v275_v57 = vld [vmem:[#allocation8 + $0xd0] sm:$0xff]  ;;  %v274_v58 = vld [vmem:[#allocation8 + $0xc8] sm:$0xff] }
  0x5a   :  { %170 = vmatpush1.msra.mxu1 %v131_v4  ;;  %v273_v61 = vld [vmem:[#allocation8 + $0xc0] sm:$0xff]  ;;  %v272_v62 = vld [vmem:[#allocation8 + $0xb8] sm:$0xff]  ;;  %v271_v1 = vld [vmem:[#allocation8 + $0xb0] sm:$0xff] }
  0x5b   :  { %939 = vmatmul.mubr.msk.f32.vlgmr.msra.gmra.mxu1 %vm135_vm0, %v130_v5  ;;  %v270_v2 = vld [vmem:[#allocation8 + $0xa8] sm:$0xff]  ;;  %v269_v5 = vld [vmem:[#allocation8 + $0xa0] sm:$0xff]  ;;  %v268_v6 = vld [vmem:[#allocation8 + $0x98] sm:$0xff] }
 0x11b   :  { %v205_v8 = vpop.f32.mrf.mxu1 }
 0x11c   :  { %v210_v9 = vrot.slane %v205_v8, 4 }
 0x11d   :  { %v207_v10 = vpop.f32.mrf.mxu1 }
 0x11e   :  { %v211_v11 = vadd.f32 %v210_v9, %v205_v8  ;;  %v216_v12 = vrot.slane %v207_v10, 4  ;;  %v267_v9 = vld [vmem:[#allocation8 + $0x90] sm:$0xff] }
 0x120   :  { %v212_v13 = vrot.slane %v211_v11, 2  ;;  %v217_v14 = vadd.f32 %v216_v12, %v207_v10 }
 0x122   :  { %v213_v15 = vadd.f32 %v212_v13, %v211_v11  ;;  %v218_v16 = vrot.slane %v217_v14, 2  ;;  %v265_v13 = vld [vmem:[#allocation8 + $0x80] sm:$0xff] }
 0x124   :  { %v214_v17 = vrot.slane %v213_v15, 1  ;;  %v219_v18 = vadd.f32 %v218_v16, %v217_v14  ;;  %v264_v14 = vld [vmem:[#allocation8 + $0x78] sm:$0xff] }
 0x126   :  { %v215_v19 = vadd.f32 %v214_v17, %v213_v15  ;;  %v220_v20 = vrot.slane %v219_v18, 1  ;;  %v263_v17 = vld [vmem:[#allocation8 + $0x70] sm:$0xff] }
 0x128   :  { %v223_v21 = vmul.f32 0.125, %v215_v19  ;;  %v221_v22 = vadd.f32 %v220_v20, %v219_v18  ;;  %v262_v18 = vld [vmem:[#allocation8 + $0x68] sm:$0xff] }
 0x12a   :  { %v1302_v23 = vsub.f32 %v205_v8, %v223_v21  ;;  %v224_v24 = vmul.f32 0.125, %v221_v22  ;;  %v261_v21 = vld [vmem:[#allocation8 + $0x60] sm:$0xff]  ;;  %v260_v22 = vld [vmem:[#allocation8 + $0x58] sm:$0xff] }
 0x12c   :  { %v227_v25 = vmul.f32 %v1302_v23, %v1302_v23  ;;  %v226_v26 = vsub.f32 %v207_v10, %v224_v24  ;;  %v266_v10 = vld [vmem:[#allocation8 + $0x88] sm:$0xff] }
 0x12e   :  { %v229_v27 = vrot.slane %v227_v25, 4  ;;  %v228_v28 = vmul.f32 %v226_v26, %v226_v26  ;;  %v244_v29 = vmax.f32 %v226_v26, 0.0  ;;  %v259_v26 = vld [vmem:[#allocation8 + $0x50] sm:$0xff] }
 0x130   :  { %v230_v30 = vadd.f32 %v229_v27, %v227_v25  ;;  %v235_v31 = vrot.slane %v228_v28, 4  ;;  %377 = vmatprep.mubr.f32.mxu1 %v244_v29  ;;  %v258_v27 = vld [vmem:[#allocation8 + $0x48] sm:$0xff] }
 0x132   :  { %v231_v32 = vrot.slane %v230_v30, 2  ;;  %v236_v33 = vadd.f32 %v235_v31, %v228_v28  ;;  %v256_v31 = vld [vmem:[#allocation8 + $0x38] sm:$0xff] }
 0x134   :  { %v232_v34 = vadd.f32 %v231_v32, %v230_v30  ;;  %v237_v35 = vrot.slane %v236_v33, 2  ;;  %v257_v30 = vld [vmem:[#allocation8 + $0x40] sm:$0xff] }
 0x136   :  { %v233_v36 = vrot.slane %v232_v34, 1  ;;  %v238_v37 = vadd.f32 %v237_v35, %v236_v33  ;;  %v254_v35 = vld [vmem:[#allocation8 + $0x28] sm:$0xff] }
 0x138   :  { %v234_v38 = vadd.f32 %v233_v36, %v232_v34  ;;  %v239_v39 = vrot.slane %v238_v37, 1  ;;  %v255_v34 = vld [vmem:[#allocation8 + $0x30] sm:$0xff] }
 0x13a   :  { %v241_v40 = vmul.f32 0.125, %v234_v38  ;;  %v240_v41 = vadd.f32 %v239_v39, %v238_v37  ;;  %v253_v38 = vld [vmem:[#allocation8 + $0x20] sm:$0xff]  ;;  %v252_v39 = vld [vmem:[#allocation8 + $0x18] sm:$0xff] }
 0x13c   :  { %v245_v42 = vadd.f32 1e-05, %v241_v40  ;;  %v242_v43 = vmul.f32 0.125, %v240_v41 }
 0x13e   :  { %v246_v44 = vadd.f32 1e-05, %v242_v43  ;;  %1030 = vrsqrt.f32 %v245_v42  ;;  %v251_v42 = vld [vmem:[#allocation8 + $0x10] sm:$0xff]  ;;  %v250_v43 = vld [vmem:[#allocation8 + $0x8] sm:$0xff] }
 0x140   :  { %1032 = vrsqrt.f32 %v246_v44 }
 0x14b   :  { %v1306_v46 = vpop.eup %1030 }
 0x14c   :  { %v311_v51 = vmul.f32 %v1306_v46, %v279_v47  ;;  %v309_v55 = vmul.f32 %v1306_v46, %v277_v53  ;;  %v307_v59 = vmul.f32 %v1306_v46, %v275_v57  ;;  %v305_v63 = vmul.f32 %v1306_v46, %v273_v61  ;;  %v249_v47 = vld [vmem:[#allocation8] sm:$0xff]  ;;  %v580_v53 = vld [vmem:[#allocation11 + $0xf0] sm:$0xff]  ;;  %v559_v61 = vld [vmem:[#allocation11 + $0x48] sm:$0xff] }
 0x14d   :  { %v1308_v48 = vpop.eup %1032  ;;  %v303_v3 = vmul.f32 %v1306_v46, %v271_v1  ;;  %v301_v7 = vmul.f32 %v1306_v46, %v269_v5  ;;  %v299_v11 = vmul.f32 %v1306_v46, %v267_v9  ;;  %v297_v15 = vmul.f32 %v1306_v46, %v265_v13  ;;  %v562_v57 = vld [vmem:[#allocation11 + $0x60] sm:$0xff]  ;;  %v557_v1 = vld [vmem:[#allocation11 + $0x38] sm:$0xff]  ;;  %v555_v5 = vld [vmem:[#allocation11 + $0x28] sm:$0xff] }
 0x14e   :  { %v312_v50 = vmul.f32 %v1308_v48, %v280_v45  ;;  %v310_v52 = vmul.f32 %v1308_v48, %v278_v49  ;;  %v308_v56 = vmul.f32 %v1308_v48, %v276_v54  ;;  %v306_v60 = vmul.f32 %v1308_v48, %v274_v58  ;;  %v564_v54 = vld [vmem:[#allocation11 + $0x70] sm:$0xff]  ;;  %v553_v9 = vld [vmem:[#allocation11 + $0x18] sm:$0xff]  ;;  %v551_v13 = vld [vmem:[#allocation11 + $0x8] sm:$0xff] }
 0x14f   :  { %v304_v0 = vmul.f32 %v1308_v48, %v272_v62  ;;  %v302_v4 = vmul.f32 %v1308_v48, %v270_v2  ;;  %v300_v8 = vmul.f32 %v1308_v48, %v268_v6  ;;  %v298_v12 = vmul.f32 %v1308_v48, %v266_v10  ;;  %v576_v58 = vld [vmem:[#allocation11 + $0xd0] sm:$0xff]  ;;  %v574_v62 = vld [vmem:[#allocation11 + $0xc0] sm:$0xff] }
 0x150   :  { %313 = vmatprep.subr.mxu1 %v312_v50  ;;  %v296_v16 = vmul.f32 %v1308_v48, %v264_v14  ;;  %v295_v19 = vmul.f32 %v1306_v46, %v263_v17  ;;  %v294_v20 = vmul.f32 %v1308_v48, %v262_v18  ;;  %v293_v24 = vmul.f32 %v1306_v46, %v261_v21  ;;  %v572_v2 = vld [vmem:[#allocation11 + $0xb0] sm:$0xff]  ;;  %v570_v6 = vld [vmem:[#allocation11 + $0xa0] sm:$0xff] }
 0x151   :  { %314 = vmatpush1.xpose.msra.mxu1 %v311_v51  ;;  %v292_v25 = vmul.f32 %v1308_v48, %v260_v22  ;;  %v291_v28 = vmul.f32 %v1306_v46, %v259_v26  ;;  %v290_v29 = vmul.f32 %v1308_v48, %v258_v27  ;;  %v289_v32 = vmul.f32 %v1306_v46, %v257_v30  ;;  %v581_v51 = vld [vmem:[#allocation11 + $0xf8] sm:$0xff]  ;;  %v568_v10 = vld [vmem:[#allocation11 + $0x90] sm:$0xff] }
 0x152   :  { %315 = vmatprep.subr.mxu1 %v310_v52  ;;  %v288_v33 = vmul.f32 %v1308_v48, %v256_v31  ;;  %v287_v36 = vmul.f32 %v1306_v46, %v255_v34  ;;  %v286_v37 = vmul.f32 %v1308_v48, %v254_v35  ;;  %v285_v40 = vmul.f32 %v1306_v46, %v253_v38  ;;  %v565_v52 = vld [vmem:[#allocation11 + $0x78] sm:$0xff]  ;;  %v940_v14 = vld [vmem:[%s1444_s5] ss:$0 sm:$0xff] }
 0x153   :  { %v284_v41 = vmul.f32 %v1308_v48, %v252_v39  ;;  %v283_v44 = vmul.f32 %v1306_v46, %v251_v42  ;;  %v282_v45 = vmul.f32 %v1308_v48, %v250_v43  ;;  %v281_v49 = vmul.f32 %v1306_v46, %v249_v47  ;;  %944 = vmatprep.subr.mxu0 %v581_v51  ;;  %v563_v48 = vld [vmem:[#allocation11 + $0x68] sm:$0xff]  ;;  %v577_v46 = vld [vmem:[#allocation11 + $0xd8] sm:$0xff]  ;;  %v500_v51 = vld [vmem:[#allocation10 + $0x70] sm:$0xff] }
 0x154   :  { %v243_v50 = vmax.f32 %v1302_v23, 0.0  ;;  %945 = vmatpush3.xpose.msra.mxu0 %v565_v52  ;;  %v561_v23 = vld [vmem:[#allocation11 + $0x58] sm:$0xff]  ;;  %v515_v52 = vld [vmem:[#allocation10 + $0xe8] sm:$0xff] }
 0x155   :  { %316 = vmatpush1.xpose.msra.mxu1 %v309_v55  ;;  %946 = vmatprep.subr.mxu0 %v580_v53  ;;  %v579_v55 = vld [vmem:[#allocation11 + $0xe8] sm:$0xff]  ;;  %v517_v42 = vld [vmem:[#allocation10 + $0xf8] sm:$0xff] }
 0x156   :  { %317 = vmatprep.subr.mxu1 %v308_v56  ;;  %v578_v56 = vld [vmem:[#allocation11 + $0xe0] sm:$0xff]  ;;  %v501_v43 = vld [vmem:[#allocation10 + $0x78] sm:$0xff] }
 0x158   :  { %947 = vmatpush3.xpose.msra.mxu0 %v564_v54 }
 0x159   :  { %318 = vmatpush1.xpose.msra.mxu1 %v307_v59  ;;  %948 = vmatprep.subr.mxu0 %v579_v55  ;;  %v560_v59 = vld [vmem:[#allocation11 + $0x50] sm:$0xff]  ;;  %v499_v55 = vld [vmem:[#allocation10 + $0x68] sm:$0xff] }
 0x15a   :  { %319 = vmatprep.subr.mxu1 %v306_v60  ;;  %v575_v60 = vld [vmem:[#allocation11 + $0xc8] sm:$0xff] }
 0x15c   :  { %949 = vmatpush3.xpose.msra.mxu0 %v563_v48  ;;  %v514_v48 = vld [vmem:[#allocation10 + $0xe0] sm:$0xff] }
 0x15d   :  { %320 = vmatpush1.xpose.msra.mxu1 %v305_v63  ;;  %950 = vmatprep.subr.mxu0 %v578_v56  ;;  %v558_v63 = vld [vmem:[#allocation11 + $0x40] sm:$0xff] }
 0x15e   :  { %321 = vmatprep.subr.mxu1 %v304_v0  ;;  %v573_v0 = vld [vmem:[#allocation11 + $0xb8] sm:$0xff] }
 0x160   :  { %951 = vmatpush3.xpose.msra.mxu0 %v562_v57 }
 0x161   :  { %322 = vmatpush1.xpose.msra.mxu1 %v303_v3  ;;  %952 = vmatprep.subr.mxu0 %v577_v46  ;;  %v556_v3 = vld [vmem:[#allocation11 + $0x30] sm:$0xff]  ;;  %v498_v46 = vld [vmem:[#allocation10 + $0x60] sm:$0xff] }
 0x162   :  { %323 = vmatprep.subr.mxu1 %v302_v4  ;;  %v571_v4 = vld [vmem:[#allocation11 + $0xa8] sm:$0xff] }
 0x164   :  { %953 = vmatpush3.xpose.msra.mxu0 %v561_v23  ;;  %v513_v23 = vld [vmem:[#allocation10 + $0xd8] sm:$0xff] }
 0x165   :  { %324 = vmatpush1.xpose.msra.mxu1 %v301_v7  ;;  %954 = vmatprep.subr.mxu0 %v576_v58  ;;  %v554_v7 = vld [vmem:[#allocation11 + $0x20] sm:$0xff] }
 0x166   :  { %325 = vmatprep.subr.mxu1 %v300_v8  ;;  %v569_v8 = vld [vmem:[#allocation11 + $0x98] sm:$0xff] }
 0x168   :  { %955 = vmatpush3.xpose.msra.mxu0 %v560_v59 }
 0x169   :  { %326 = vmatpush1.xpose.msra.mxu1 %v299_v11  ;;  %956 = vmatprep.subr.mxu0 %v575_v60  ;;  %v552_v11 = vld [vmem:[#allocation11 + $0x10] sm:$0xff]  ;;  %v497_v60 = vld [vmem:[#allocation10 + $0x58] sm:$0xff] }
 0x16a   :  { %327 = vmatprep.subr.mxu1 %v298_v12  ;;  %v567_v12 = vld [vmem:[#allocation11 + $0x88] sm:$0xff] }
 0x16c   :  { %957 = vmatpush3.xpose.msra.mxu0 %v559_v61  ;;  %v512_v61 = vld [vmem:[#allocation10 + $0xd0] sm:$0xff] }
 0x16d   :  { %328 = vmatpush1.xpose.msra.mxu1 %v297_v15  ;;  %958 = vmatprep.subr.mxu0 %v574_v62  ;;  %v481_v15 = vpop.f32.mrf.mxu0 }
 0x16e   :  { %329 = vmatprep.subr.mxu1 %v296_v16  ;;  %v566_v16 = vld [vmem:[#allocation11 + $0x80] sm:$0xff]  ;;  %v482_v17 = vadd.f32 %v940_v14, %v481_v15 }
 0x16f   :  { %v1016_v18 = vpop.f32.mrf.mxu0 }
 0x170   :  { %959 = vmatpush3.xpose.msra.mxu0 %v558_v63 }
 0x171   :  { %330 = vmatpush1.xpose.msra.mxu1 %v295_v19  ;;  %960 = vmatprep.subr.mxu0 %v573_v0  ;;  %v485_v19 = vmax.f32 %v482_v17, 0.0  ;;  %v496_v0 = vld [vmem:[#allocation10 + $0x50] sm:$0xff]  ;;  %v507_v17 = vld [vmem:[#allocation10 + $0xa8] sm:$0xff] }
 0x172   :  { %331 = vmatprep.subr.mxu1 %v294_v20  ;;  %v550_v20 = vld [vmem:[#allocation11] sm:$0xff] }
 0x173   :  { %976 = vmatprep.mubr.f32.mxu0 %v485_v19 }
 0x174   :  { %961 = vmatpush3.xpose.msra.mxu0 %v557_v1  ;;  %v511_v1 = vld [vmem:[#allocation10 + $0xc8] sm:$0xff] }
 0x175   :  { %332 = vmatpush1.xpose.msra.mxu1 %v293_v24  ;;  %962 = vmatprep.subr.mxu0 %v572_v2 }
 0x176   :  { %333 = vmatprep.subr.mxu1 %v292_v25 }
 0x178   :  { %963 = vmatpush3.xpose.msra.mxu0 %v556_v3 }
 0x179   :  { %334 = vmatpush1.xpose.msra.mxu1 %v291_v28  ;;  %964 = vmatprep.subr.mxu0 %v571_v4  ;;  %v495_v4 = vld [vmem:[#allocation10 + $0x48] sm:$0xff] }
 0x17a   :  { %335 = vmatprep.subr.mxu1 %v290_v29 }
 0x17c   :  { %965 = vmatpush3.xpose.msra.mxu0 %v555_v5  ;;  %v510_v5 = vld [vmem:[#allocation10 + $0xc0] sm:$0xff] }
 0x17d   :  { %336 = vmatpush1.xpose.msra.mxu1 %v289_v32  ;;  %966 = vmatprep.subr.mxu0 %v570_v6 }
 0x17e   :  { %337 = vmatprep.subr.mxu1 %v288_v33 }
 0x180   :  { %967 = vmatpush3.xpose.msra.mxu0 %v554_v7 }
 0x181   :  { %338 = vmatpush1.xpose.msra.mxu1 %v287_v36  ;;  %968 = vmatprep.subr.mxu0 %v569_v8  ;;  %v494_v8 = vld [vmem:[#allocation10 + $0x40] sm:$0xff] }
 0x182   :  { %339 = vmatprep.subr.mxu1 %v286_v37 }
 0x184   :  { %969 = vmatpush3.xpose.msra.mxu0 %v553_v9  ;;  %v509_v9 = vld [vmem:[#allocation10 + $0xb8] sm:$0xff] }
 0x185   :  { %340 = vmatpush1.xpose.msra.mxu1 %v285_v40  ;;  %970 = vmatprep.subr.mxu0 %v568_v10 }
 0x186   :  { %341 = vmatprep.subr.mxu1 %v284_v41 }
 0x188   :  { %971 = vmatpush3.xpose.msra.mxu0 %v552_v11 }
 0x189   :  { %342 = vmatpush1.xpose.msra.mxu1 %v283_v44  ;;  %972 = vmatprep.subr.mxu0 %v567_v12  ;;  %v493_v12 = vld [vmem:[#allocation10 + $0x38] sm:$0xff] }
 0x18a   :  { %343 = vmatprep.subr.mxu1 %v282_v45  ;;  %v516_v45 = vld [vmem:[#allocation10 + $0xf0] sm:$0xff] }
 0x18c   :  { %973 = vmatpush3.xpose.msra.mxu0 %v551_v13  ;;  %v508_v13 = vld [vmem:[#allocation10 + $0xb0] sm:$0xff] }
 0x18d   :  { %344 = vmatpush1.xpose.msra.mxu1 %v281_v49  ;;  %974 = vmatprep.subr.mxu0 %v566_v16  ;;  %v492_v16 = vld [vmem:[#allocation10 + $0x30] sm:$0xff] }
 0x190   :  { %378 = vmatmul.mubr.f32.vlgmr.msra.gmra.mxu1 %v243_v50  ;;  %975 = vmatpush3.xpose.msra.mxu0 %v550_v20  ;;  %v491_v20 = vld [vmem:[#allocation10 + $0x28] sm:$0xff] }
 0x193   :  { %977 = vmatmul.mubr.f32.vlgmr.msra.gmra.mxu0 %v485_v19 }
 0x250   :  { %v379_v21 = vpop.f32.mrf.mxu1 }
 0x251   :  { %v383_v22 = vrot.slane %v379_v21, 4 }
 0x252   :  { %v381_v24 = vpop.f32.mrf.mxu1 }
 0x253   :  { %v384_v25 = vadd.f32 %v383_v22, %v379_v21 }
 0x255   :  { %v385_v26 = vrot.slane %v384_v25, 2 }
 0x257   :  { %v386_v27 = vadd.f32 %v385_v26, %v384_v25  ;;  %v490_v25 = vld [vmem:[#allocation10 + $0x20] sm:$0xff]  ;;  %v505_v26 = vld [vmem:[#allocation10 + $0x98] sm:$0xff] }
 0x259   :  { %v387_v28 = vrot.slane %v386_v27, 1 }
 0x25b   :  { %v388_v29 = vadd.f32 %v387_v28, %v386_v27 }
 0x25d   :  { %v389_v30 = vmul.f32 0.125, %v388_v29  ;;  %v489_v29 = vld [vmem:[#allocation10 + $0x18] sm:$0xff] }
 0x25f   :  { %v1346_v31 = vsub.f32 %v379_v21, %v389_v30  ;;  %v506_v21 = vld [vmem:[#allocation10 + $0xa0] sm:$0xff]  ;;  %v504_v30 = vld [vmem:[#allocation10 + $0x90] sm:$0xff] }
 0x261   :  { %v391_v32 = vmul.f32 %v1346_v31, %v1346_v31  ;;  %v399_v33 = vmax.f32 %v1346_v31, 0.0 }
 0x263   :  { %v392_v34 = vrot.slane %v391_v32, 4  ;;  %1010 = vmatprep.mubr.f32.mxu1 %v399_v33 }
 0x265   :  { %v393_v35 = vadd.f32 %v392_v34, %v391_v32 }
 0x267   :  { %v394_v36 = vrot.slane %v393_v35, 2 }
 0x269   :  { %v395_v37 = vadd.f32 %v394_v36, %v393_v35  ;;  %v488_v35 = vld [vmem:[#allocation10 + $0x10] sm:$0xff]  ;;  %v503_v36 = vld [vmem:[#allocation10 + $0x88] sm:$0xff] }
 0x26b   :  { %v396_v38 = vrot.slane %v395_v37, 1 }
 0x26d   :  { %v397_v39 = vadd.f32 %v396_v38, %v395_v37 }
 0x26f   :  { %v398_v40 = vmul.f32 0.125, %v397_v39  ;;  %v487_v39 = vld [vmem:[#allocation10 + $0x8] sm:$0xff] }
 0x271   :  { %v400_v41 = vadd.f32 1e-05, %v398_v40  ;;  %v502_v40 = vld [vmem:[#allocation10 + $0x80] sm:$0xff] }
 0x273   :  { %1034 = vrsqrt.f32 %v400_v41 }
 0x280   :  { %v1353_v44 = vpop.eup %1034 }
 0x281   :  { %v549_v47 = vmul.f32 %v1353_v44, %v517_v42  ;;  %v533_v49 = vmul.f32 %v1353_v44, %v501_v43  ;;  %v548_v50 = vmul.f32 %v1353_v44, %v516_v45  ;;  %v532_v53 = vmul.f32 %v1353_v44, %v500_v51  ;;  %v486_v43 = vld [vmem:[#allocation10] sm:$0xff] }
 0x282   :  { %v547_v54 = vmul.f32 %v1353_v44, %v515_v52  ;;  %v531_v56 = vmul.f32 %v1353_v44, %v499_v55  ;;  %v546_v57 = vmul.f32 %v1353_v44, %v514_v48  ;;  %v530_v58 = vmul.f32 %v1353_v44, %v498_v46 }
 0x283   :  { %978 = vmatprep.subr.mxu1 %v549_v47  ;;  %v545_v59 = vmul.f32 %v1353_v44, %v513_v23  ;;  %v529_v62 = vmul.f32 %v1353_v44, %v497_v60  ;;  %v544_v63 = vmul.f32 %v1353_v44, %v512_v61  ;;  %v528_v2 = vmul.f32 %v1353_v44, %v496_v0  ;;  %v648_v47 = vpop.f32.mrf.mxu0 }
 0x284   :  { %979 = vmatpush3.xpose.msra.mxu1 %v533_v49  ;;  %v543_v3 = vmul.f32 %v1353_v44, %v511_v1  ;;  %v527_v6 = vmul.f32 %v1353_v44, %v495_v4  ;;  %v542_v7 = vmul.f32 %v1353_v44, %v510_v5  ;;  %v526_v10 = vmul.f32 %v1353_v44, %v494_v8 }
 0x285   :  { %980 = vmatprep.subr.mxu1 %v548_v50  ;;  %v541_v11 = vmul.f32 %v1353_v44, %v509_v9  ;;  %v525_v14 = vmul.f32 %v1353_v44, %v493_v12  ;;  %v540_v15 = vmul.f32 %v1353_v44, %v508_v13  ;;  %v524_v18 = vmul.f32 %v1353_v44, %v492_v16  ;;  %v650_v51 = vpop.f32.mrf.mxu0 }
 0x286   :  { %v539_v19 = vmul.f32 %v1353_v44, %v507_v17  ;;  %v523_v22 = vmul.f32 %v1353_v44, %v491_v20  ;;  %v538_v24 = vmul.f32 %v1353_v44, %v506_v21  ;;  %v522_v27 = vmul.f32 %v1353_v44, %v490_v25  ;;  %v792_v21 = vld [vmem:[#allocation13 + $0xf0] sm:$0xff] }
 0x287   :  { %v537_v28 = vmul.f32 %v1353_v44, %v505_v26  ;;  %v521_v32 = vmul.f32 %v1353_v44, %v489_v29  ;;  %v536_v34 = vmul.f32 %v1353_v44, %v504_v30  ;;  %v520_v37 = vmul.f32 %v1353_v44, %v488_v35  ;;  %v789_v29 = vld [vmem:[#allocation13 + $0xd8] sm:$0xff]  ;;  %v787_v35 = vld [vmem:[#allocation13 + $0xc8] sm:$0xff] }
 0x288   :  { %981 = vmatpush3.xpose.msra.mxu1 %v532_v53  ;;  %v535_v38 = vmul.f32 %v1353_v44, %v503_v36  ;;  %v519_v41 = vmul.f32 %v1353_v44, %v487_v39  ;;  %v534_v42 = vmul.f32 %v1353_v44, %v502_v40  ;;  %v518_v45 = vmul.f32 %v1353_v44, %v486_v43  ;;  %v785_v39 = vld [vmem:[#allocation13 + $0xb8] sm:$0xff]  ;;  %v783_v43 = vld [vmem:[#allocation13 + $0xa8] sm:$0xff] }
 0x289   :  { %982 = vmatprep.subr.mxu1 %v547_v54 }
 0x28c   :  { %983 = vmatpush3.xpose.msra.mxu1 %v531_v56 }
 0x28d   :  { %984 = vmatprep.subr.mxu1 %v546_v57 }
 0x290   :  { %985 = vmatpush3.xpose.msra.mxu1 %v530_v58 }
 0x291   :  { %986 = vmatprep.subr.mxu1 %v545_v59 }
 0x294   :  { %987 = vmatpush3.xpose.msra.mxu1 %v529_v62 }
 0x295   :  { %988 = vmatprep.subr.mxu1 %v544_v63 }
 0x298   :  { %989 = vmatpush3.xpose.msra.mxu1 %v528_v2 }
 0x299   :  { %990 = vmatprep.subr.mxu1 %v543_v3 }
 0x29c   :  { %991 = vmatpush3.xpose.msra.mxu1 %v527_v6 }
 0x29d   :  { %992 = vmatprep.subr.mxu1 %v542_v7 }
 0x2a0   :  { %993 = vmatpush3.xpose.msra.mxu1 %v526_v10 }
 0x2a1   :  { %994 = vmatprep.subr.mxu1 %v541_v11 }
 0x2a4   :  { %995 = vmatpush3.xpose.msra.mxu1 %v525_v14 }
 0x2a5   :  { %996 = vmatprep.subr.mxu1 %v540_v15 }
 0x2a8   :  { %997 = vmatpush3.xpose.msra.mxu1 %v524_v18 }
 0x2a9   :  { %998 = vmatprep.subr.mxu1 %v539_v19  ;;  %v793_v19 = vld [vmem:[#allocation13 + $0xf8] sm:$0xff] }
 0x2ac   :  { %999 = vmatpush3.xpose.msra.mxu1 %v523_v22 }
 0x2ad   :  { %1000 = vmatprep.subr.mxu1 %v538_v24  ;;  %v791_v24 = vld [vmem:[#allocation13 + $0xe8] sm:$0xff] }
 0x2b0   :  { %1001 = vmatpush3.xpose.msra.mxu1 %v522_v27 }
 0x2b1   :  { %1002 = vmatprep.subr.mxu1 %v537_v28  ;;  %v790_v28 = vld [vmem:[#allocation13 + $0xe0] sm:$0xff] }
 0x2b4   :  { %1003 = vmatpush3.xpose.msra.mxu1 %v521_v32 }
 0x2b5   :  { %1004 = vmatprep.subr.mxu1 %v536_v34  ;;  %v788_v34 = vld [vmem:[#allocation13 + $0xd0] sm:$0xff] }
 0x2b8   :  { %1005 = vmatpush3.xpose.msra.mxu1 %v520_v37 }
 0x2b9   :  { %1006 = vmatprep.subr.mxu1 %v535_v38  ;;  %v786_v38 = vld [vmem:[#allocation13 + $0xc0] sm:$0xff] }
 0x2bc   :  { %1007 = vmatpush3.xpose.msra.mxu1 %v519_v41 }
 0x2bd   :  { %1008 = vmatprep.subr.mxu1 %v534_v42  ;;  %v784_v42 = vld [vmem:[#allocation13 + $0xb0] sm:$0xff] }
 0x2c0   :  { %1009 = vmatpush3.xpose.msra.mxu1 %v518_v45 }
 0x2c3   :  { %1011 = vmatmul.mubr.f32.vlgmr.msra.gmra.mxu1 %v399_v33 }
 0x383   :  { %v719_v49 = vpop.f32.mrf.mxu1 }
 0x384   :  { %v720_v50 = vadd.f32 %v719_v49, %v648_v47  ;;  %v782_v49 = vld [vmem:[#allocation13 + $0xa0] sm:$0xff] }
 0x385   :  { %v721_v52 = vpop.f32.mrf.mxu1 }
 0x386   :  { %v724_v53 = vrot.slane %v720_v50, 4  ;;  %v722_v54 = vadd.f32 %v721_v52, %v650_v51 }
 0x388   :  { %v725_v55 = vadd.f32 %v724_v53, %v720_v50  ;;  %v730_v48 = vrot.slane %v722_v54, 4  ;;  %v780_v53 = vld [vmem:[#allocation13 + $0x90] sm:$0xff] }
 0x38a   :  { %v726_v56 = vrot.slane %v725_v55, 2  ;;  %v731_v57 = vadd.f32 %v730_v48, %v722_v54 }
 0x38c   :  { %v727_v46 = vadd.f32 %v726_v56, %v725_v55  ;;  %v732_v23 = vrot.slane %v731_v57, 2  ;;  %v778_v56 = vld [vmem:[#allocation13 + $0x80] sm:$0xff] }
 0x38e   :  { %v728_v58 = vrot.slane %v727_v46, 1  ;;  %v733_v59 = vadd.f32 %v732_v23, %v731_v57  ;;  %v777_v57 = vld [vmem:[#allocation13 + $0x78] sm:$0xff] }
 0x390   :  { %v729_v44 = vadd.f32 %v728_v58, %v727_v46  ;;  %v734_v60 = vrot.slane %v733_v59, 1  ;;  %v776_v58 = vld [vmem:[#allocation13 + $0x70] sm:$0xff] }
 0x392   :  { %v736_v61 = vmul.f32 0.125, %v729_v44  ;;  %v735_v31 = vadd.f32 %v734_v60, %v733_v59  ;;  %v775_v59 = vld [vmem:[#allocation13 + $0x68] sm:$0xff] }
 0x394   :  { %v1389_v33 = vsub.f32 %v720_v50, %v736_v61  ;;  %v737_v62 = vmul.f32 0.125, %v735_v31  ;;  %v781_v50 = vld [vmem:[#allocation13 + $0x98] sm:$0xff]  ;;  %v774_v61 = vld [vmem:[#allocation13 + $0x60] sm:$0xff] }
 0x395   :  { %v773_v31 = vld [vmem:[#allocation13 + $0x58] sm:$0xff] }
 0x396   :  { %v740_v63 = vmul.f32 %v1389_v33, %v1389_v33  ;;  %v739_v0 = vsub.f32 %v722_v54, %v737_v62  ;;  %v779_v54 = vld [vmem:[#allocation13 + $0x88] sm:$0xff] }
 0x398   :  { %v742_v1 = vrot.slane %v740_v63, 4  ;;  %v741_v2 = vmul.f32 %v739_v0, %v739_v0  ;;  %v757_v3 = vmax.f32 %v739_v0, 0.0  ;;  %v772_v0 = vld [vmem:[#allocation13 + $0x50] sm:$0xff] }
 0x39a   :  { %v743_v4 = vadd.f32 %v742_v1, %v740_v63  ;;  %v748_v5 = vrot.slane %v741_v2, 4  ;;  %890 = vmatprep.mubr.f32.mxu0 %v757_v3  ;;  %v771_v1 = vld [vmem:[#allocation13 + $0x48] sm:$0xff] }
 0x39c   :  { %v744_v6 = vrot.slane %v743_v4, 2  ;;  %v749_v7 = vadd.f32 %v748_v5, %v741_v2  ;;  %v769_v5 = vld [vmem:[#allocation13 + $0x38] sm:$0xff] }
 0x39e   :  { %v745_v8 = vadd.f32 %v744_v6, %v743_v4  ;;  %v750_v9 = vrot.slane %v749_v7, 2  ;;  %v770_v4 = vld [vmem:[#allocation13 + $0x40] sm:$0xff] }
 0x3a0   :  { %v746_v10 = vrot.slane %v745_v8, 1  ;;  %v751_v11 = vadd.f32 %v750_v9, %v749_v7  ;;  %v767_v9 = vld [vmem:[#allocation13 + $0x28] sm:$0xff] }
 0x3a2   :  { %v747_v12 = vadd.f32 %v746_v10, %v745_v8  ;;  %v752_v13 = vrot.slane %v751_v11, 1  ;;  %v768_v8 = vld [vmem:[#allocation13 + $0x30] sm:$0xff] }
 0x3a4   :  { %v754_v14 = vmul.f32 0.125, %v747_v12  ;;  %v753_v15 = vadd.f32 %v752_v13, %v751_v11  ;;  %v766_v12 = vld [vmem:[#allocation13 + $0x20] sm:$0xff]  ;;  %v765_v13 = vld [vmem:[#allocation13 + $0x18] sm:$0xff] }
 0x3a6   :  { %v758_v16 = vadd.f32 1e-05, %v754_v14  ;;  %v755_v17 = vmul.f32 0.125, %v753_v15 }
 0x3a8   :  { %v759_v18 = vadd.f32 1e-05, %v755_v17  ;;  %1036 = vrsqrt.f32 %v758_v16  ;;  %v764_v16 = vld [vmem:[#allocation13 + $0x10] sm:$0xff]  ;;  %v763_v17 = vld [vmem:[#allocation13 + $0x8] sm:$0xff] }
 0x3aa   :  { %1038 = vrsqrt.f32 %v759_v18 }
 0x3b5   :  { %v1393_v20 = vpop.eup %1036 }
 0x3b6   :  { %v824_v26 = vmul.f32 %v1393_v20, %v792_v21  ;;  %v822_v30 = vmul.f32 %v1393_v20, %v790_v28  ;;  %v820_v36 = vmul.f32 %v1393_v20, %v788_v34  ;;  %v818_v40 = vmul.f32 %v1393_v20, %v786_v38  ;;  %v762_v21 = vld [vmem:[#allocation13] sm:$0xff] }
 0x3b7   :  { %v1395_v22 = vpop.eup %1038  ;;  %v816_v45 = vmul.f32 %v1393_v20, %v784_v42  ;;  %v814_v51 = vmul.f32 %v1393_v20, %v782_v49  ;;  %v812_v55 = vmul.f32 %v1393_v20, %v780_v53  ;;  %v810_v46 = vmul.f32 %v1393_v20, %v778_v56  ;;  %v915_v49 = vld [vmem:[%s1448_s9] sm:$0x1] }
 0x3b8   :  { %v825_v25 = vmul.f32 %v1395_v22, %v793_v19  ;;  %v823_v27 = vmul.f32 %v1395_v22, %v791_v24  ;;  %v821_v32 = vmul.f32 %v1395_v22, %v789_v29  ;;  %v819_v37 = vmul.f32 %v1395_v22, %v787_v35 }
 0x3b9   :  { %v817_v41 = vmul.f32 %v1395_v22, %v785_v39  ;;  %v815_v47 = vmul.f32 %v1395_v22, %v783_v43  ;;  %v813_v52 = vmul.f32 %v1395_v22, %v781_v50  ;;  %v811_v48 = vmul.f32 %v1395_v22, %v779_v54 }
 0x3ba   :  { %826 = vmatprep.subr.mxu0 %v825_v25  ;;  %v809_v23 = vmul.f32 %v1395_v22, %v777_v57  ;;  %v808_v44 = vmul.f32 %v1393_v20, %v776_v58  ;;  %v807_v60 = vmul.f32 %v1395_v22, %v775_v59  ;;  %v806_v62 = vmul.f32 %v1393_v20, %v774_v61 }
 0x3bb   :  { %827 = vmatpush1.xpose.msra.mxu0 %v824_v26  ;;  %v805_v63 = vmul.f32 %v1395_v22, %v773_v31  ;;  %v804_v2 = vmul.f32 %v1393_v20, %v772_v0  ;;  %v803_v3 = vmul.f32 %v1395_v22, %v771_v1  ;;  %v802_v6 = vmul.f32 %v1393_v20, %v770_v4 }
 0x3bc   :  { %828 = vmatprep.subr.mxu0 %v823_v27  ;;  %v801_v7 = vmul.f32 %v1395_v22, %v769_v5  ;;  %v800_v10 = vmul.f32 %v1393_v20, %v768_v8  ;;  %v799_v11 = vmul.f32 %v1395_v22, %v767_v9  ;;  %v798_v14 = vmul.f32 %v1393_v20, %v766_v12 }
 0x3bd   :  { %v797_v15 = vmul.f32 %v1395_v22, %v765_v13  ;;  %v796_v18 = vmul.f32 %v1393_v20, %v764_v16  ;;  %v795_v19 = vmul.f32 %v1395_v22, %v763_v17  ;;  %v794_v24 = vmul.f32 %v1393_v20, %v762_v21 }
 0x3be   :  { %v756_v25 = vmax.f32 %v1389_v33, 0.0 }
 0x3bf   :  { %829 = vmatpush1.xpose.msra.mxu0 %v822_v30 }
 0x3c0   :  { %830 = vmatprep.subr.mxu0 %v821_v32 }
 0x3c3   :  { %831 = vmatpush1.xpose.msra.mxu0 %v820_v36 }
 0x3c4   :  { %832 = vmatprep.subr.mxu0 %v819_v37 }
 0x3c7   :  { %833 = vmatpush1.xpose.msra.mxu0 %v818_v40 }
 0x3c8   :  { %834 = vmatprep.subr.mxu0 %v817_v41 }
 0x3cb   :  { %835 = vmatpush1.xpose.msra.mxu0 %v816_v45  ;;  %v918_v45 = vlaneseq }
 0x3cc   :  { %836 = vmatprep.subr.mxu0 %v815_v47 }
 0x3cd   :  { %v919_v47 = vshrl.u32 %v918_v45, 7 }
 0x3cf   :  { %837 = vmatpush1.xpose.msra.mxu0 %v814_v51  ;;  %v920_v50 = vsub.s32 0, %v919_v47 }
 0x3d0   :  { %838 = vmatprep.subr.mxu0 %v813_v52 }
 0x3d3   :  { %839 = vmatpush1.xpose.msra.mxu0 %v812_v55 }
 0x3d4   :  { %840 = vmatprep.subr.mxu0 %v811_v48  ;;  %v927_v48 = vstv %s1449_s10 }
 0x3d7   :  { %841 = vmatpush1.xpose.msra.mxu0 %v810_v46 }
 0x3d8   :  { %842 = vmatprep.subr.mxu0 %v809_v23 }
 0x3db   :  { %843 = vmatpush1.xpose.msra.mxu0 %v808_v44 }
 0x3dc   :  { %844 = vmatprep.subr.mxu0 %v807_v60 }
 0x3df   :  { %845 = vmatpush1.xpose.msra.mxu0 %v806_v62 }
 0x3e0   :  { %846 = vmatprep.subr.mxu0 %v805_v63 }
 0x3e3   :  { %847 = vmatpush1.xpose.msra.mxu0 %v804_v2 }
 0x3e4   :  { %848 = vmatprep.subr.mxu0 %v803_v3 }
 0x3e7   :  { %849 = vmatpush1.xpose.msra.mxu0 %v802_v6 }
 0x3e8   :  { %850 = vmatprep.subr.mxu0 %v801_v7 }
 0x3eb   :  { %851 = vmatpush1.xpose.msra.mxu0 %v800_v10 }
 0x3ec   :  { %852 = vmatprep.subr.mxu0 %v799_v11 }
 0x3ef   :  { %853 = vmatpush1.xpose.msra.mxu0 %v798_v14 }
 0x3f0   :  { %854 = vmatprep.subr.mxu0 %v797_v15 }
 0x3f3   :  { %855 = vmatpush1.xpose.msra.mxu0 %v796_v18 }
 0x3f4   :  { %856 = vmatprep.subr.mxu0 %v795_v19 }
 0x3f7   :  { %857 = vmatpush1.xpose.msra.mxu0 %v794_v24 }
 0x3fa   :  { %891 = vmatmul.mubr.f32.vlgmr.msra.gmra.mxu0 %v756_v25 }
 0x4ba   :  { %v892_v26 = vpop.f32.mrf.mxu0 }
 0x4bb   :  { %v896_v27 = vrot.slane %v892_v26, 4 }
 0x4bc   :  { %v894_v28 = vpop.f32.mrf.mxu0 }
 0x4bd   :  { %v897_v29 = vadd.f32 %v896_v27, %v892_v26 }
 0x4bf   :  { %v898_v30 = vrot.slane %v897_v29, 2 }
 0x4c1   :  { %v899_v32 = vadd.f32 %v898_v30, %v897_v29 }
 0x4c3   :  { %v900_v34 = vrot.slane %v899_v32, 1 }
 0x4c5   :  { %v901_v35 = vadd.f32 %v900_v34, %v899_v32 }
 0x4c7   :  { %v902_v36 = vmul.f32 0.125, %v901_v35 }
 0x4c9   :  { %v903_v37 = vsub.f32 %v892_v26, %v902_v36 }
 0x4cb   :  { %v904_v22 = vmul.f32 %v903_v37, %v903_v37  ;;  %v912_v53 = vmax.f32 %v903_v37, 0.0 }
 0x4cd   :  { %v905_v38 = vrot.slane %v904_v22, 4 }
 0x4cf   :  { %v906_v39 = vadd.f32 %v905_v38, %v904_v22 }
 0x4d1   :  { %v907_v40 = vrot.slane %v906_v39, 2 }
 0x4d3   :  { %v908_v41 = vadd.f32 %v907_v40, %v906_v39 }
 0x4d5   :  { %v909_v20 = vrot.slane %v908_v41, 1 }
 0x4d7   :  { %v910_v42 = vadd.f32 %v909_v20, %v908_v41 }
 0x4d9   :  { %v911_v43 = vmul.f32 0.125, %v910_v42 }
 0x4db   :  { %v913_v33 = vadd.f32 1e-05, %v911_v43 }
 0x4dd   :  { %1040 = vrsqrt.f32 %v913_v33 }
 0x4ea   :  { %v1041_v51 = vpop.eup %1040 }
 0x4eb   :  { %v916_v52 = vmul.f32 %v1041_v51, %v915_v49 }
 0x4ed   :  { %v921_v54 = vrot.slane %v916_v52, %v920_v50 }
 0x4ef   :  { %v923_v55 = vmul.f32 %v921_v54, %v912_v53 }
 0x4f1   :  { %924 = vadd.xlane.f32.xlu0 %v923_v55 }
 0x57a   :  { %v925_v56 = vpop.xlane.xlu0 %924 }
 0x57b   :  { %v928_v57 = vadd.f32 %v927_v48, %v925_v56 }
 0x57d   :  { %930 = vst.msk [vmem:[%s1450_s11] sm:$0xff] %vm929_vm3, %v928_v57 }
 0x57e   :  { %935 = vsyncpa [#allocation4], 1 }
 0x57f   :  { %936 = vsyncpa [#allocation6], 1 }
 0x580   :  { %937 = vsyncpa [#allocation9], 1 }
 0x581   :  { %938 = vsyncpa [#allocation12], 1 }

</bundles_post_ra>
